<compile_context>
chip_gen: v7x
topology: tpu7x:2x2x1
jax: 0.10.0
libtpu: 0.0.40
codegen_flags: <defaults>
</compile_context>

<pallas_src>
import jax
import jax.numpy as jnp
from jax import lax
from jax.experimental import pallas as pl
from jax.experimental.pallas import tpu as pltpu


# ----------------------------- Pallas kernel --------------------------------

def resblock_kernel(x_ref, w1_ref, b1_ref, w2_ref, b2_ref, o_ref):
    # x_ref : (Bn, Cin, L)          f32   batch block, L on the lane axis
    # w1_ref: (Cout, 3*Cin)         bf16  conv1 taps stacked along contraction axis
    # w2_ref: (Cout, 3*Cout + Cin)  bf16  conv2 taps ++ 1x1 shortcut (fused)
    # b1_ref: (Cout, 1)             f32   conv1 bias
    # b2_ref: (Cout, 1)             f32   conv2 bias + shortcut bias (pre-folded)
    # o_ref : (Bn, Cout, L)         bf16
    Bn, _, L = x_ref.shape

    # Loop-invariant reads (weights are VMEM-resident; read once, reuse for all Bn).
    w1 = w1_ref[...]
    w2 = w2_ref[...]
    b1 = b1_ref[...]
    b2 = b2_ref[...]

    def taps(a):
        # Build [a[:, l-1]; a[:, l]; a[:, l+1]] stacked on the contraction (sublane)
        # axis, with the pad=1 zero boundary folded directly into the build
        # (zero edge column + slice -> no masks, no selects).
        z = jnp.zeros((a.shape[0], 1), a.dtype)
        left = jnp.concatenate([z, a[:, : L - 1]], axis=1)    # a[:, l-1], 0 at l=0
        right = jnp.concatenate([a[:, 1:], z], axis=1)        # a[:, l+1], 0 at l=L-1
        return jnp.concatenate([left, a, right], axis=0)      # (3*C, L)

    def body(b, carry):
        x = x_ref[b]                                           # (Cin, L) f32

        # ---- conv1 (k=3, pad=1): ONE fat bf16 MXU matmul, f32 accumulation ----
        xs = taps(x).astype(jnp.bfloat16)                      # (3*Cin, L)
        h = jnp.dot(w1, xs, preferred_element_type=jnp.float32) + b1

        # ---- LeakyReLU(0.2) ----
        h = jnp.maximum(h, 0.2 * h)

        # ---- conv2 (k=3, pad=1) + 1x1 shortcut: ONE fused matmul ----
        zs = jnp.concatenate([taps(h), x], axis=0).astype(jnp.bfloat16)  # (3*Cout+Cin, L)
        acc = jnp.dot(w2, zs, preferred_element_type=jnp.float32) + b2

        o_ref[b] = acc.astype(o_ref.dtype)
        return carry

    lax.fori_loop(0, Bn, body, 0, unroll=True)


# ----------------------------- wrapper ---------------------------------------

def _largest_divisor_leq(n, cap):
    for b in range(min(n, cap), 0, -1):
        if n % b == 0:
            return b
    return 1


def residual_block(x_ncl, params, *, batch_block=8, out_dtype=jnp.bfloat16):
    """x_ncl: (N, Cin, L) float32 (PyTorch Conv1d layout). Returns (N, Cout, L) bf16."""
    w1s, b1, w2c, b2c = params
    N, Cin, L = x_ncl.shape
    Cout = w1s.shape[0]

    Bn = _largest_divisor_leq(N, batch_block)   # batch elements per grid step

    out = pl.pallas_call(
        resblock_kernel,
        out_shape=jax.ShapeDtypeStruct((N, Cout, L), out_dtype),
        grid_spec=pltpu.PrefetchScalarGridSpec(
            num_scalar_prefetch=0,
            grid=(N // Bn,),  # batch-block per step -> auto double-buffered DMA
            in_specs=[
                pl.BlockSpec((Bn, Cin, L), lambda n: (n, 0, 0)),
                # constant block index -> weights stay VMEM-resident across steps
                pl.BlockSpec((Cout, 3 * Cin), lambda n: (0, 0)),
                pl.BlockSpec((Cout, 1), lambda n: (0, 0)),
                pl.BlockSpec((Cout, 3 * Cout + Cin), lambda n: (0, 0)),
                pl.BlockSpec((Cout, 1), lambda n: (0, 0)),
            ],
            out_specs=pl.BlockSpec((Bn, Cout, L), lambda n: (n, 0, 0)),
        ),
        compiler_params=pltpu.CompilerParams(
            # batch axis is independent -> shard across v7x's 2 TensorCores
            dimension_semantics=("parallel",)),
    )(x_ncl, w1s, b1, w2c, b2c)
    return out


# ------------------------- parameter setup (plain JAX) -----------------------

def spectral_normalize(w, key, n_power_iterations=1, eps=1e-12):
    """PyTorch-style spectral norm: divide the weight by its top singular value,
    estimated with power iteration over weight.reshape(out, -1)."""
    w_mat = w.reshape(w.shape[0], -1)
    u = jax.random.normal(key, (w_mat.shape[0],), dtype=w.dtype)
    u = u / (jnp.linalg.norm(u) + eps)
    v = w_mat.T @ u
    v = v / (jnp.linalg.norm(v) + eps)
    for _ in range(max(1, n_power_iterations)):
        u = w_mat @ v
        u = u / (jnp.linalg.norm(u) + eps)
        v = w_mat.T @ u
        v = v / (jnp.linalg.norm(v) + eps)
    sigma = u @ (w_mat @ v)
    return w / sigma


def make_params(key, in_channels, out_channels):
    ks = jax.random.split(key, 9)
    # PyTorch weight layouts: conv1 (Cout, Cin, 3), conv2 (Cout, Cout, 3),
    # shortcut (Cout, Cin, 1).
    w1_t = 0.1 * jax.random.normal(ks[0], (out_channels, in_channels, 3), jnp.float32)
    b1 = 0.1 * jax.random.normal(ks[1], (out_channels,), jnp.float32)
    w2_t = 0.1 * jax.random.normal(ks[2], (out_channels, out_channels, 3), jnp.float32)
    b2 = 0.1 * jax.random.normal(ks[3], (out_channels,), jnp.float32)

    # spectral_norm reparameterization (deterministic u init per weight).
    w1_t = spectral_normalize(w1_t, ks[6])
    w2_t = spectral_normalize(w2_t, ks[7])

    if in_channels != out_channels:
        ws_t = 0.1 * jax.random.normal(ks[4], (out_channels, in_channels, 1), jnp.float32)
        bs = 0.1 * jax.random.normal(ks[5], (out_channels,), jnp.float32)
        ws_t = spectral_normalize(ws_t, ks[8])
    else:
        # nn.Identity() shortcut == 1x1 conv with identity weight / zero bias.
        ws_t = jnp.eye(out_channels, dtype=jnp.float32)[:, :, None]
        bs = jnp.zeros((out_channels,), jnp.float32)

    raw = (w1_t, b1, w2_t, b2, ws_t, bs)

    # Kernel packing:
    #  * conv1: taps stacked along the contraction axis -> (Cout, 3*Cin) with column
    #    blocks [k=0 (x[l-1]) | k=1 (x[l]) | k=2 (x[l+1])], matching taps() order.
    #  * conv2 + 1x1 shortcut fused into ONE weight (Cout, 3*Cout + Cin).
    #  * shortcut bias folded into the conv2 bias.
    w1s = jnp.transpose(w1_t, (0, 2, 1)).reshape(out_channels, 3 * in_channels)
    w2s = jnp.transpose(w2_t, (0, 2, 1)).reshape(out_channels, 3 * out_channels)
    w2c = jnp.concatenate([w2s, ws_t[:, :, 0]], axis=1)
    b2c = b2 + bs

    kernel_params = (w1s.astype(jnp.bfloat16), b1.reshape(-1, 1).astype(jnp.float32),
                     w2c.astype(jnp.bfloat16), b2c.reshape(-1, 1).astype(jnp.float32))
    return kernel_params, raw


# ------------------------------ reference ------------------------------------

def residual_block_ref(x_ncl, raw_params):
    """Plain-JAX reference mirroring the kernel numerics (bf16 matmul inputs, f32
    accumulation) using the original PyTorch-layout weights."""
    w1, b1, w2, b2, ws, bs = raw_params
    xb = x_ncl.astype(jnp.bfloat16)

    def conv3(ab, w, b):
        n, c, l = ab.shape
        wb = w.astype(jnp.bfloat16)
        z = jnp.zeros((n, c, 1), ab.dtype)
        left = jnp.concatenate([z, ab[:, :, : l - 1]], axis=2)   # a[:, :, l-1]
        right = jnp.concatenate([ab[:, :, 1:], z], axis=2)       # a[:, :, l+1]
        out = jnp.einsum('oc,ncl->nol', wb[:, :, 0], left,
                         preferred_element_type=jnp.float32)
        out = out + jnp.einsum('oc,ncl->nol', wb[:, :, 1], ab,
                               preferred_element_type=jnp.float32)
        out = out + jnp.einsum('oc,ncl->nol', wb[:, :, 2], right,
                               preferred_element_type=jnp.float32)
        return out + b[None, :, None]

    h = conv3(xb, w1, b1)
    h = jnp.maximum(h, 0.2 * h)
    y = conv3(h.astype(jnp.bfloat16), w2, b2)
    s = jnp.einsum('oc,ncl->nol', ws[:, :, 0].astype(jnp.bfloat16), xb,
                   preferred_element_type=jnp.float32) + bs[None, :, None]
    return y + s


# ------------------------------ main ------------------------------------------

if __name__ == "__main__":
    N, C_IN, C_OUT, L = 2, 4, 8, 16

    key = jax.random.PRNGKey(0)
    kx, kp = jax.random.split(key)
    x = jax.random.normal(kx, (N, C_IN, L), jnp.float32)
    kernel_params, raw_params = make_params(kp, C_IN, C_OUT)

    out = jax.block_until_ready(residual_block(x, kernel_params))
    ref = residual_block_ref(x, raw_params)

    assert out.shape == (N, C_OUT, L)
    assert out.dtype == jnp.bfloat16
    assert jnp.allclose(out.astype(jnp.float32), ref, atol=2e-2, rtol=2e-2), \
        "mismatch vs reference"

    print("KERNEL_OK")
</pallas_src>

<mosaic_0001>
module attributes {stable_mosaic.version = 11 : i64} {
  func.func @resblock_kernel(%arg0: i32, %arg1: memref<2x4x16xf32, #tpu.memory_space<vmem>>, %arg2: memref<8x12xbf16, #tpu.memory_space<vmem>>, %arg3: memref<8x1xf32, #tpu.memory_space<vmem>>, %arg4: memref<8x28xbf16, #tpu.memory_space<vmem>>, %arg5: memref<8x1xf32, #tpu.memory_space<vmem>>, %arg6: memref<2x8x16xbf16, #tpu.memory_space<vmem>>) attributes {dimension_semantics = [#tpu.dimension_semantics<parallel>], iteration_bounds = array<i64: 1>, scalar_prefetch = 0 : i64, scratch_operands = 0 : i64, tpu.core_type = #tpu.core_type<tc>, window_params = [{transform_indices = @transform_0, window_bounds = array<i64: 2, 4, 16>}, {pipeline_mode = #tpu.pipeline_mode<synchronous>, transform_indices = @transform_1, window_bounds = array<i64: 8, 12>}, {pipeline_mode = #tpu.pipeline_mode<synchronous>, transform_indices = @transform_2, window_bounds = array<i64: 8, 1>}, {pipeline_mode = #tpu.pipeline_mode<synchronous>, transform_indices = @transform_3, window_bounds = array<i64: 8, 28>}, {pipeline_mode = #tpu.pipeline_mode<synchronous>, transform_indices = @transform_4, window_bounds = array<i64: 8, 1>}, {transform_indices = @transform_5, window_bounds = array<i64: 2, 8, 16>}]} {
    %c0 = arith.constant 0 : index
    %c0_0 = arith.constant 0 : index
    %0 = vector.load %arg2[%c0, %c0_0] : memref<8x12xbf16, #tpu.memory_space<vmem>>, vector<8x12xbf16>
    %c0_1 = arith.constant 0 : index
    %c0_2 = arith.constant 0 : index
    %1 = vector.load %arg4[%c0_1, %c0_2] : memref<8x28xbf16, #tpu.memory_space<vmem>>, vector<8x28xbf16>
    %c0_3 = arith.constant 0 : index
    %c0_4 = arith.constant 0 : index
    %2 = vector.load %arg3[%c0_3, %c0_4] : memref<8x1xf32, #tpu.memory_space<vmem>>, vector<8x1xf32>
    %c0_5 = arith.constant 0 : index
    %c0_6 = arith.constant 0 : index
    %3 = vector.load %arg5[%c0_5, %c0_6] : memref<8x1xf32, #tpu.memory_space<vmem>>, vector<8x1xf32>
    %c0_i32 = arith.constant 0 : i32
    %4 = arith.index_cast %c0_i32 : i32 to index
    %c0_7 = arith.constant 0 : index
    %c0_8 = arith.constant 0 : index
    %5 = vector.load %arg1[%4, %c0_7, %c0_8] : memref<2x4x16xf32, #tpu.memory_space<vmem>>, vector<1x4x16xf32>
    %6 = vector.shape_cast %5 : vector<1x4x16xf32> to vector<4x16xf32>
    %cst = arith.constant 0.000000e+00 : f32
    %7 = vector.broadcast %cst : f32 to vector<4x1xf32>
    %8 = vector.extract_strided_slice %6 {offsets = [0, 0], sizes = [4, 15], strides = [1, 1]} : vector<4x16xf32> to vector<4x15xf32>
    %9 = tpu.concatenate %7, %8 in 1 : vector<4x1xf32>, vector<4x15xf32> -> vector<4x16xf32>
    %10 = vector.extract_strided_slice %6 {offsets = [0, 1], sizes = [4, 15], strides = [1, 1]} : vector<4x16xf32> to vector<4x15xf32>
    %11 = tpu.concatenate %10, %7 in 1 : vector<4x15xf32>, vector<4x1xf32> -> vector<4x16xf32>
    %12 = tpu.concatenate %9, %6, %11 in 0 : vector<4x16xf32>, vector<4x16xf32>, vector<4x16xf32> -> vector<12x16xf32>
    %13 = arith.truncf %12 : vector<12x16xf32> to vector<12x16xbf16>
    %cst_9 = arith.constant dense<0.000000e+00> : vector<8x16xf32>
    %14 = tpu.matmul %0, %13, %cst_9 {dimension_numbers = #tpu.dot_dimension_numbers<[1], [0], [0], [1], [0, 0, 1, 1], [], []>} : vector<8x12xbf16>, vector<12x16xbf16>, vector<8x16xf32> -> vector<8x16xf32>
    %15 = vector.broadcast %2 : vector<8x1xf32> to vector<8x16xf32>
    %16 = arith.addf %14, %15 : vector<8x16xf32>
    %cst_10 = arith.constant 2.000000e-01 : f32
    %17 = vector.broadcast %cst_10 : f32 to vector<8x16xf32>
    %18 = arith.mulf %17, %16 : vector<8x16xf32>
    %19 = arith.maximumf %16, %18 : vector<8x16xf32>
    %cst_11 = arith.constant 0.000000e+00 : f32
    %20 = vector.broadcast %cst_11 : f32 to vector<8x1xf32>
    %21 = vector.extract_strided_slice %19 {offsets = [0, 0], sizes = [8, 15], strides = [1, 1]} : vector<8x16xf32> to vector<8x15xf32>
    %22 = tpu.concatenate %20, %21 in 1 : vector<8x1xf32>, vector<8x15xf32> -> vector<8x16xf32>
    %23 = vector.extract_strided_slice %19 {offsets = [0, 1], sizes = [8, 15], strides = [1, 1]} : vector<8x16xf32> to vector<8x15xf32>
    %24 = tpu.concatenate %23, %20 in 1 : vector<8x15xf32>, vector<8x1xf32> -> vector<8x16xf32>
    %25 = tpu.concatenate %22, %19, %24 in 0 : vector<8x16xf32>, vector<8x16xf32>, vector<8x16xf32> -> vector<24x16xf32>
    %26 = tpu.concatenate %25, %6 in 0 : vector<24x16xf32>, vector<4x16xf32> -> vector<28x16xf32>
    %27 = arith.truncf %26 : vector<28x16xf32> to vector<28x16xbf16>
    %cst_12 = arith.constant dense<0.000000e+00> : vector<8x16xf32>
    %28 = tpu.matmul %1, %27, %cst_12 {dimension_numbers = #tpu.dot_dimension_numbers<[1], [0], [0], [1], [0, 0, 1, 1], [], []>} : vector<8x28xbf16>, vector<28x16xbf16>, vector<8x16xf32> -> vector<8x16xf32>
    %29 = vector.broadcast %3 : vector<8x1xf32> to vector<8x16xf32>
    %30 = arith.addf %28, %29 : vector<8x16xf32>
    %31 = arith.truncf %30 : vector<8x16xf32> to vector<8x16xbf16>
    %32 = arith.index_cast %c0_i32 : i32 to index
    %c0_13 = arith.constant 0 : index
    %c0_14 = arith.constant 0 : index
    %33 = vector.load %arg6[%32, %c0_13, %c0_14] : memref<2x8x16xbf16, #tpu.memory_space<vmem>>, vector<1x8x16xbf16>
    %34 = vector.shape_cast %33 : vector<1x8x16xbf16> to vector<8x16xbf16>
    %35 = vector.shape_cast %31 : vector<8x16xbf16> to vector<1x8x16xbf16>
    tpu.vector_store %arg6[%32, %c0_13, %c0_14], %35 {strides = array<i32>} : memref<2x8x16xbf16, #tpu.memory_space<vmem>>, vector<1x8x16xbf16>,
    %c1_i32 = arith.constant 1 : i32
    %36 = arith.index_cast %c1_i32 : i32 to index
    %c0_15 = arith.constant 0 : index
    %c0_16 = arith.constant 0 : index
    %37 = vector.load %arg1[%36, %c0_15, %c0_16] : memref<2x4x16xf32, #tpu.memory_space<vmem>>, vector<1x4x16xf32>
    %38 = vector.shape_cast %37 : vector<1x4x16xf32> to vector<4x16xf32>
    %cst_17 = arith.constant 0.000000e+00 : f32
    %39 = vector.broadcast %cst_17 : f32 to vector<4x1xf32>
    %40 = vector.extract_strided_slice %38 {offsets = [0, 0], sizes = [4, 15], strides = [1, 1]} : vector<4x16xf32> to vector<4x15xf32>
    %41 = tpu.concatenate %39, %40 in 1 : vector<4x1xf32>, vector<4x15xf32> -> vector<4x16xf32>
    %42 = vector.extract_strided_slice %38 {offsets = [0, 1], sizes = [4, 15], strides = [1, 1]} : vector<4x16xf32> to vector<4x15xf32>
    %43 = tpu.concatenate %42, %39 in 1 : vector<4x15xf32>, vector<4x1xf32> -> vector<4x16xf32>
    %44 = tpu.concatenate %41, %38, %43 in 0 : vector<4x16xf32>, vector<4x16xf32>, vector<4x16xf32> -> vector<12x16xf32>
    %45 = arith.truncf %44 : vector<12x16xf32> to vector<12x16xbf16>
    %cst_18 = arith.constant dense<0.000000e+00> : vector<8x16xf32>
    %46 = tpu.matmul %0, %45, %cst_18 {dimension_numbers = #tpu.dot_dimension_numbers<[1], [0], [0], [1], [0, 0, 1, 1], [], []>} : vector<8x12xbf16>, vector<12x16xbf16>, vector<8x16xf32> -> vector<8x16xf32>
    %47 = vector.broadcast %2 : vector<8x1xf32> to vector<8x16xf32>
    %48 = arith.addf %46, %47 : vector<8x16xf32>
    %cst_19 = arith.constant 2.000000e-01 : f32
    %49 = vector.broadcast %cst_19 : f32 to vector<8x16xf32>
    %50 = arith.mulf %49, %48 : vector<8x16xf32>
    %51 = arith.maximumf %48, %50 : vector<8x16xf32>
    %cst_20 = arith.constant 0.000000e+00 : f32
    %52 = vector.broadcast %cst_20 : f32 to vector<8x1xf32>
    %53 = vector.extract_strided_slice %51 {offsets = [0, 0], sizes = [8, 15], strides = [1, 1]} : vector<8x16xf32> to vector<8x15xf32>
    %54 = tpu.concatenate %52, %53 in 1 : vector<8x1xf32>, vector<8x15xf32> -> vector<8x16xf32>
    %55 = vector.extract_strided_slice %51 {offsets = [0, 1], sizes = [8, 15], strides = [1, 1]} : vector<8x16xf32> to vector<8x15xf32>
    %56 = tpu.concatenate %55, %52 in 1 : vector<8x15xf32>, vector<8x1xf32> -> vector<8x16xf32>
    %57 = tpu.concatenate %54, %51, %56 in 0 : vector<8x16xf32>, vector<8x16xf32>, vector<8x16xf32> -> vector<24x16xf32>
    %58 = tpu.concatenate %57, %38 in 0 : vector<24x16xf32>, vector<4x16xf32> -> vector<28x16xf32>
    %59 = arith.truncf %58 : vector<28x16xf32> to vector<28x16xbf16>
    %cst_21 = arith.constant dense<0.000000e+00> : vector<8x16xf32>
    %60 = tpu.matmul %1, %59, %cst_21 {dimension_numbers = #tpu.dot_dimension_numbers<[1], [0], [0], [1], [0, 0, 1, 1], [], []>} : vector<8x28xbf16>, vector<28x16xbf16>, vector<8x16xf32> -> vector<8x16xf32>
    %61 = vector.broadcast %3 : vector<8x1xf32> to vector<8x16xf32>
    %62 = arith.addf %60, %61 : vector<8x16xf32>
    %63 = arith.truncf %62 : vector<8x16xf32> to vector<8x16xbf16>
    %64 = arith.index_cast %c1_i32 : i32 to index
    %c0_22 = arith.constant 0 : index
    %c0_23 = arith.constant 0 : index
    %65 = vector.load %arg6[%64, %c0_22, %c0_23] : memref<2x8x16xbf16, #tpu.memory_space<vmem>>, vector<1x8x16xbf16>
    %66 = vector.shape_cast %65 : vector<1x8x16xbf16> to vector<8x16xbf16>
    %67 = vector.shape_cast %63 : vector<8x16xbf16> to vector<1x8x16xbf16>
    tpu.vector_store %arg6[%64, %c0_22, %c0_23], %67 {strides = array<i32>} : memref<2x8x16xbf16, #tpu.memory_space<vmem>>, vector<1x8x16xbf16>,
    %c2_i32 = arith.constant 2 : i32
    return
  }
  func.func @transform_0(%arg0: i32) -> (i32, i32, i32) {
    %c0_i32 = arith.constant 0 : i32
    %c0_i32_0 = arith.constant 0 : i32
    %c0_i32_1 = arith.constant 0 : i32
    return %arg0, %c0_i32, %c0_i32_0 : i32, i32, i32
  }
  func.func @transform_1(%arg0: i32) -> (i32, i32) {
    %c0_i32 = arith.constant 0 : i32
    %c0_i32_0 = arith.constant 0 : i32
    %c0_i32_1 = arith.constant 0 : i32
    return %c0_i32, %c0_i32_0 : i32, i32
  }
  func.func @transform_2(%arg0: i32) -> (i32, i32) {
    %c0_i32 = arith.constant 0 : i32
    %c0_i32_0 = arith.constant 0 : i32
    %c0_i32_1 = arith.constant 0 : i32
    return %c0_i32, %c0_i32_0 : i32, i32
  }
  func.func @transform_3(%arg0: i32) -> (i32, i32) {
    %c0_i32 = arith.constant 0 : i32
    %c0_i32_0 = arith.constant 0 : i32
    %c0_i32_1 = arith.constant 0 : i32
    return %c0_i32, %c0_i32_0 : i32, i32
  }
  func.func @transform_4(%arg0: i32) -> (i32, i32) {
    %c0_i32 = arith.constant 0 : i32
    %c0_i32_0 = arith.constant 0 : i32
    %c0_i32_1 = arith.constant 0 : i32
    return %c0_i32, %c0_i32_0 : i32, i32
  }
  func.func @transform_5(%arg0: i32) -> (i32, i32, i32) {
    %c0_i32 = arith.constant 0 : i32
    %c0_i32_0 = arith.constant 0 : i32
    %c0_i32_1 = arith.constant 0 : i32
    return %arg0, %c0_i32, %c0_i32_0 : i32, i32, i32
  }
}

</mosaic_0001>

<bundles_post_ra>
// kernel: tpu_custom_call.1
= control target key start
LH: loop header
LB: loop body
LE: loop exit
PB: predicated region body
PF: predicated region fallthrough
CT: control target
= control target key end

     0   :  { %s382_s22 = smov 1   ;;  %s504_s0 = inlined_call_operand.vmem [shape: f32[2,4,16], index: 0, kind: input, shape index: {}]   ;;  %s505_s1 = inlined_call_operand.vmem [shape: bf16[8,12], index: 1, kind: input, shape index: {}]   ;;  %s506_s2 = inlined_call_operand.vmem [shape: f32[8,1], index: 2, kind: input, shape index: {}]   ;;  %s507_s3 = inlined_call_operand.vmem [shape: bf16[8,28], index: 3, kind: input, shape index: {}]   ;;  %s508_s4 = inlined_call_operand.vmem [shape: f32[8,1], index: 4, kind: input, shape index: {}]   ;;  %s509_s5 = inlined_call_operand.hbm [shape: bf16[2,8,16], index: 5, kind: output, shape index: {}]  }
   0x1   :  { %v424_v0 = vld [vmem:[%s504_s0] sm:$0xf]  ;;  %v429_v1 = vld [vmem:[%s504_s0 + $0x4] sm:$0xf] }
   0x2   :  { %28 = vrot.lane.b32.xlu0 %v424_v0, %s382_s22  ;;  %167 = vrot.lane.b32.xlu1 %v429_v1, %s382_s22 }
   0x3   :  { %10 = vsyncpa [#allocation3], 0  ;;  %v383_v2 = vmov 0.0   ;;  %vm384_vm0 = vmmov 0   ;;  %s385_s0 = smov 127   ;;  %v24_v3 = vld [vmem:[%s506_s2] sm:$0xff] }
   0x4   :  { %320 = vmatprep.subr.bf16.mxu0 %v383_v2  ;;  %322 = vmatprep.mubr.msk.bf16.mxu0 %vm384_vm0, %v383_v2  ;;  %v386_v4 = vmov 0   ;;  %vm31_vm1 = vcmask 7168   ;;  %v175_v5 = vrot.slane %v429_v1, 4  ;;  %v38_v9 = vrot.slane %v424_v0, 4  ;;  %v22_v20 = vld [vmem:[%s505_s1] sm:$0xf] }
   0x5   :  { %326 = vmatprep.subr.bf16.mxu1 %v383_v2  ;;  %330 = vmatprep.mubr.msk.bf16.mxu1 %vm384_vm0, %v383_v2  ;;  %vm36_vm2 = vcmask 121856   ;;  %vm40_vm3 = vcmask 1043456   ;;  %vm52_vm4 = vcmask 1045504   ;;  %vm48_vm5 = vcmask 97280   ;;  %v25_v37 = vld [vmem:[%s508_s4] sm:$0xff]  ;;  %vm298_vm6 = vmneg %vm31_vm1 }
   0x6   :  { %33 = vrot.lane.b32.xlu0 %v424_v0, %s385_s0  ;;  %171 = vrot.lane.b32.xlu1 %v429_v1, %s385_s0  ;;  %vm387_vm7 = vmmov 1   ;;  %v23_v48 = vld [vmem:[%s507_s3] sm:$0xf]  ;;  %vm114_vm9 = vcmask 228352   ;;  %vm162_vm10 = vcmask 125952   ;;  %s388_s3 = smov [#allocation2]  }
   0x7   :  { %357 = vset.pattern.permute.xlu0 %v386_v4  ;;  %vm470_vm8 = vmpackc.low %vm387_vm7, %vm298_vm6  ;;  %s286_s28 = sshll.u32 %s388_s3, 4  ;;  %s287_s28 = int_to_ptr.vmem [resolvable:$true] %s286_s28 }
   0x8   :  { %s358_s29 = scalar_lea.vmem %s287_s28, 128  ;;  %p363_p1 = scmp.lt.s32.totalorder %s287_s28, %s287_s28 }
   0x9   :  { %p359_p0 = scmp.ne.s32.totalorder %s287_s28, %s358_s29  ;;  %p364_p2 = scmp.lt.s32.totalorder %s358_s29, %s358_s29 }
   0xa   :  { %45 = vperm.xlu0 %357, %v24_v3  }
   0xb   :  { %p365_p3 = por %p364_p2, %p363_p1 }
   0xd   :  { %p366_p4 = pnand %p365_p3, %p359_p0 }
  0x74   :  { %v29_v6 = vpop.permute.xlu0 %28  ;;  %v168_v7 = vpop.permute.xlu1 %167 }
  0x75   :  { %v170_v8 = vsel %vm31_vm1, 0.0, %v168_v7  ;;  %v32_v10 = vsel %vm31_vm1, 0.0, %v29_v6 }
  0x76   :  { %v177_v11 = vsel %vm40_vm3, %v170_v8, %v175_v5  ;;  %v41_v15 = vsel %vm40_vm3, %v32_v10, %v38_v9 }
  0x78   :  { %v34_v12 = vpop.permute.xlu0 %33  ;;  %v172_v13 = vpop.permute.xlu1 %171 }
  0x79   :  { %v37_v14 = vsel %vm36_vm2, %v34_v12, 0.0  ;;  %v174_v16 = vsel %vm36_vm2, %v172_v13, 0.0 }
  0x7a   :  { %v42_v17 = vpack.c.bf16 %v37_v14, %v41_v15  ;;  %v178_v18 = vpack.c.bf16 %v174_v16, %v177_v11 }
  0x7c   :  { %v54_v19 = vsel %vm52_vm4, %v42_v17, 0  ;;  %v180_v21 = vsel %vm52_vm4, %v178_v18, 0 }
  0x7d   :  { %321 = vmatpush3.bf16.msra.mxu0 %v54_v19 }
  0x7e   :  { %334 = vmatprep.subr.bf16.mxu0 %v383_v2 }
  0x80   :  { %323 = vmatmul.mubr.msk.bf16.vlgmr.msra.gmra.mrb[0].mxu0 %vm48_vm5, %v22_v20 }
  0x81   :  { %335 = vmatpush3.bf16.msra.mxu0 %v180_v21  ;;  %336 = vmatprep.mubr.msk.bf16.mxu0 %vm384_vm0, %v383_v2 }
  0x88   :  { %337 = vmatmul.mubr.msk.bf16.vlgmr.msra.gmra.mrb[4].mxu0 %vm48_vm5, %v22_v20 }
  0x89   :  { %v46_v22 = vpop.permute.xlu0 %45 }
 0x153   :  { %v90_v23 = vpop.f32.mrb[0].mxu0 }
 0x154   :  { %v91_v24 = vadd.f32 %v90_v23, %v46_v22  ;;  %v324_v25 = vpop.f32.mrb[1].mxu0 }
 0x155   :  { %v93_v26 = vpop.f32.mrb[2].mxu0 }
 0x156   :  { %v96_v27 = vmul.f32 0.2, %v91_v24  ;;  %v325_v28 = vpop.f32.mrb[3].mxu0 }
 0x158   :  { %v97_v29 = vmax.f32 %v91_v24, %v96_v27 }
 0x15a   :  { %99 = vrot.lane.b32.xlu1 %v97_v29, %s382_s22 }
 0x15b   :  { %v216_v30 = vpop.f32.mrb[4].mxu0 }
 0x15c   :  { %v217_v31 = vadd.f32 %v216_v30, %v46_v22  ;;  %v338_v32 = vpop.f32.mrb[5].mxu0 }
 0x15d   :  { %v219_v33 = vpop.f32.mrb[6].mxu0 }
 0x15e   :  { %v222_v34 = vmul.f32 0.2, %v217_v31  ;;  %103 = vrot.lane.b32.xlu1 %v97_v29, %s385_s0  ;;  %v339_v35 = vpop.f32.mrb[7].mxu0 }
 0x160   :  { %v223_v36 = vmax.f32 %v217_v31, %v222_v34 }
 0x162   :  { %229 = vrot.lane.b32.xlu1 %v223_v36, %s385_s0  ;;  %225 = vrot.lane.b32.xlu0 %v223_v36, %s382_s22 }
 0x166   :  { %111 = vperm.xlu0 %357, %v25_v37  }
 0x1cc   :  { %v100_v38 = vpop.permute.xlu1 %99 }
 0x1cd   :  { %v300_v40 = vpack.c.bf16 %v97_v29, %v100_v38 }
 0x1cf   :  { %327 = vmatpush3.bf16.msk.msra.mxu1 %vm470_vm8, %v300_v40 }
 0x1d0   :  { %v104_v41 = vpop.permute.xlu1 %103  ;;  %328 = vmatprep.subr.bf16.mxu1 %v383_v2 }
 0x1d1   :  { %v106_v42 = vsel %vm36_vm2, %v104_v41, 0.0 }
 0x1d2   :  { %v108_v43 = vpack.c.bf16 %v424_v0, %v106_v42 }
 0x1d4   :  { %v230_v44 = vpop.permute.xlu1 %229  ;;  %v226_v45 = vpop.permute.xlu0 %225  ;;  %v119_v46 = vsel %vm52_vm4, %v108_v43, 0 }
 0x1d5   :  { %v232_v47 = vsel %vm36_vm2, %v230_v44, 0.0  ;;  %329 = vmatpush3.bf16.msra.mxu1 %v119_v46  ;;  %v307_v49 = vpack.c.bf16 %v223_v36, %v226_v45 }
 0x1d6   :  { %340 = vmatprep.subr.bf16.mxu1 %v383_v2  ;;  %v234_v50 = vpack.c.bf16 %v429_v1, %v232_v47 }
 0x1d8   :  { %331 = vmatmul.mubr.msk.bf16.vlgmr.msra.gmra.mrb[0].mxu1 %vm114_vm9, %v23_v48  ;;  %v236_v51 = vsel %vm52_vm4, %v234_v50, 0 }
 0x1d9   :  { %341 = vmatpush3.bf16.msk.msra.mxu1 %vm470_vm8, %v307_v49  ;;  %344 = vmatprep.mubr.msk.bf16.mxu1 %vm384_vm0, %v383_v2 }
 0x1da   :  { %342 = vmatprep.subr.bf16.mxu1 %v383_v2 }
 0x1dd   :  { %343 = vmatpush3.bf16.msra.mxu1 %v236_v51 }
 0x1e0   :  { %345 = vmatmul.mubr.msk.bf16.vlgmr.msra.gmra.mrb[4].mxu1 %vm114_vm9, %v23_v48 }
 0x1e5   :  { %v112_v52 = vpop.permute.xlu0 %111 }
 0x2ab   :  { %v155_v53 = vpop.f32.mrb[0].mxu1 }
 0x2ac   :  { %v156_v54 = vadd.f32 %v155_v53, %v112_v52  ;;  %v332_v55 = vpop.f32.mrb[1].mxu1 }
 0x2ad   :  { %v158_v56 = vpop.f32.mrb[2].mxu1 }
 0x2ae   :  { %v161_v57 = vpack.c.bf16 %v156_v54, %v156_v54  ;;  %v333_v58 = vpop.f32.mrb[3].mxu1 }
 0x2b0   :  { %163 = vst.msk [vmem:[#allocation2] sm:$0xf] %vm162_vm10, %v161_v57 }
 0x2b3   :  { %v272_v59 = vpop.f32.mrb[4].mxu1 }
 0x2b4   :  { %v273_v60 = vadd.f32 %v272_v59, %v112_v52  ;;  %v346_v61 = vpop.f32.mrb[5].mxu1 }
 0x2b5   :  { %v275_v62 = vpop.f32.mrb[6].mxu1 }
 0x2b6   :  { %v278_v63 = vpack.c.bf16 %v273_v60, %v273_v60  ;;  %v347_v0 = vpop.f32.mrb[7].mxu1 }
 0x2b8   :  { %280 = vst.msk [vmem:[#allocation2 + $0x4] sm:$0xf] %vm162_vm10, %v278_v63 }
 0x2b9   :  { %369 = shalt.err (!%p366_p4)
}
 0x2ba   :  { %s370_s7 = scalar_lea.hbm %s509_s5, 128 }
 0x2bb   :  { %p371_p5 = scmp.ne.s32.totalorder %s509_s5, %s370_s7  ;;  %p374_p6 = scmp.lt.u32.totalorder %s370_s7, %s509_s5 }
 0x2bd   :  { %p376_p7 = pnand %p374_p6, %p371_p5 }
 0x2bf   :  { %379 = shalt.err (!%p376_p7)
}
 0x2c0   :  { %s389_s12 = smov 64   ;;  %s390_s13 = smov 4  }
 0x2c1   :  { %292 = dma.vmem_to_hbm [thread:$0]  %s287_s28, 128, %s509_s5, [#allocation3], %s389_s12, %s389_s12, %s390_s13  }
 0x2c2   :  { %380 = dma.done.wait [#allocation3], 128  }
 0x2c3   :  { %381 = vsyncadd [#allocation3], 4294967168 }
 0x2c4   :  { %296 = vsyncpa [#allocation3], 1 }

</bundles_post_ra>
